<compile_context>
chip_gen: v7x
topology: tpu7x:2x2x1
jax: 0.10.0
libtpu: 0.0.40
codegen_flags: <defaults>
</compile_context>

<pallas_src>
import math

import jax
import jax.numpy as jnp
from jax.experimental import pallas as pl
from jax.experimental.pallas import tpu as pltpu


def make_mlp_kernel(n_layer: int):
    """Fused MLP kernel for a fixed (static) number of hidden layers."""

    def kernel(x_ref, ws_ref, bs_ref, wout_ref, bout_ref, o_ref):
        # x_ref    : [TB, H]
        # ws_ref   : [n_layer, H, H]   (pre-transposed: y = x @ W)
        # bs_ref   : [n_layer, 1, H]
        # wout_ref : [H, O]
        # bout_ref : [1, O]
        # o_ref    : [TB, O]           (true width, no padding)
        h = x_ref[...].astype(jnp.float32)
        for i in range(n_layer):                      # static unrolled loop (n_layer small)
            w = ws_ref[i]                             # [H, H] read once per layer
            b = bs_ref[i]                             # [1, H] read once per layer
            h = jnp.dot(h, w, preferred_element_type=jnp.float32) + b
            h = jnp.maximum(h, 0.0)                   # ReLU (f32 VPU path)

        # Dropout (eval mode) is the identity -> no-op.
        out = jnp.dot(h, wout_ref[...], preferred_element_type=jnp.float32)
        out = out + bout_ref[...]
        o_ref[...] = out.astype(o_ref.dtype)

    return kernel


def _round_up(v: int, m: int) -> int:
    return ((v + m - 1) // m) * m


def mlp_forward(x, ws, bs, w_out, b_out, *,
                no_grid_cutoff: int = 16384, tile_b: int = 4096):
    """x: [B, H]; ws: [n_layer, H, H]; bs: [n_layer, 1, H];
    w_out: [H, O]; b_out: [1, O]  -> [B, O]"""
    B, H = x.shape
    n_layer = ws.shape[0]
    O = w_out.shape[1]

    kernel = make_mlp_kernel(n_layer)

    if B <= no_grid_cutoff:
        # Single-invocation path: everything fits comfortably in VMEM
        # (x = B*H*4 bytes; at the default cutoff that is ~2 MiB), so no grid
        # -> no software-pipeline prologue/epilogue, no per-step overhead.
        return pl.pallas_call(
            kernel,
            out_shape=jax.ShapeDtypeStruct((B, O), x.dtype),
            in_specs=[pl.BlockSpec(memory_space=pltpu.MemorySpace.VMEM)] * 5,
            out_specs=pl.BlockSpec(memory_space=pltpu.MemorySpace.VMEM),
        )(x, ws, bs, w_out, b_out)

    # Batched path (very large B only): tile rows with fat tiles; weights/biases
    # stay VMEM-resident (constant block index). Batch axis is "parallel" so on
    # v7x the tiles are sharded across both TensorCores.
    B_pad = _round_up(B, tile_b)
    x_p = x if B_pad == B else jnp.pad(x, ((0, B_pad - B), (0, 0)))
    num_tiles = B_pad // tile_b

    out = pl.pallas_call(
        kernel,
        out_shape=jax.ShapeDtypeStruct((B_pad, O), x.dtype),
        grid_spec=pltpu.PrefetchScalarGridSpec(
            num_scalar_prefetch=0,
            grid=(num_tiles,),
            in_specs=[
                pl.BlockSpec((tile_b, H), lambda i: (i, 0)),            # x rows
                pl.BlockSpec((n_layer, H, H), lambda i: (0, 0, 0)),     # resident
                pl.BlockSpec((n_layer, 1, H), lambda i: (0, 0, 0)),     # resident
                pl.BlockSpec((H, O), lambda i: (0, 0)),                 # resident
                pl.BlockSpec((1, O), lambda i: (0, 0)),                 # resident
            ],
            out_specs=pl.BlockSpec((tile_b, O), lambda i: (i, 0)),      # true-width store
        ),
        compiler_params=pltpu.CompilerParams(
            dimension_semantics=("parallel",),       # shard batch tiles across TCs (v7x)
        ),
    )(x_p, ws, bs, w_out, b_out)
    return out if B_pad == B else out[:B]


def init_linear(key, in_dim, out_dim):
    """Deterministic init mimicking torch.nn.Linear. W returned as [in_dim, out_dim]."""
    kw, kb = jax.random.split(key)
    bound = 1.0 / math.sqrt(in_dim)
    w = jax.random.uniform(kw, (in_dim, out_dim), jnp.float32, -bound, bound)
    b = jax.random.uniform(kb, (1, out_dim), jnp.float32, -bound, bound)
    return w, b


def reference_mlp(x, ws, bs, w_out, b_out):
    h = x
    for i in range(ws.shape[0]):
        h = jnp.maximum(h @ ws[i] + bs[i], 0.0)
    return h @ w_out + b_out


if __name__ == "__main__":
    # Module config: funcs(n_layer=2, hidden_dim=32, output_dim=8, dpo=0.1), eval mode.
    n_layer, hidden_dim, output_dim = 2, 32, 8
    batch_small = 8
    batch_large = 1024

    key = jax.random.PRNGKey(0)
    keys = jax.random.split(key, n_layer + 3)

    hidden_ws, hidden_bs = [], []
    for i in range(n_layer):
        w, b = init_linear(keys[i], hidden_dim, hidden_dim)
        hidden_ws.append(w)
        hidden_bs.append(b)
    ws = jnp.stack(hidden_ws, axis=0)                 # [n_layer, H, H]
    bs = jnp.stack(hidden_bs, axis=0)                 # [n_layer, 1, H]
    w_out, b_out = init_linear(keys[n_layer], hidden_dim, output_dim)

    x_small = jax.random.normal(keys[n_layer + 1], (batch_small, hidden_dim), jnp.float32)
    x_large = jax.random.normal(keys[n_layer + 2], (batch_large, hidden_dim), jnp.float32)

    # 1) Small batch — single-invocation (no-grid) path.
    out_small = mlp_forward(x_small, ws, bs, w_out, b_out)
    jax.block_until_ready(out_small)
    ref_small = reference_mlp(x_small, ws, bs, w_out, b_out)
    assert out_small.shape == (batch_small, output_dim)
    assert jnp.allclose(out_small, ref_small, atol=1e-5, rtol=1e-5)

    # 2) B=1024 — still the no-grid path under the default cutoff (the fast path now).
    out_large = mlp_forward(x_large, ws, bs, w_out, b_out)
    jax.block_until_ready(out_large)
    ref_large = reference_mlp(x_large, ws, bs, w_out, b_out)
    assert out_large.shape == (batch_large, output_dim)
    assert jnp.allclose(out_large, ref_large, atol=1e-5, rtol=1e-5)

    # 3) Force the tiled grid path (for huge-B deployments) to verify its correctness:
    #    4 tiles of 256 rows, weights VMEM-resident, true-width output store.
    out_grid = mlp_forward(x_large, ws, bs, w_out, b_out,
                           no_grid_cutoff=0, tile_b=256)
    jax.block_until_ready(out_grid)
    assert out_grid.shape == (batch_large, output_dim)
    assert jnp.allclose(out_grid, ref_large, atol=1e-5, rtol=1e-5)

    print("KERNEL_OK")
</pallas_src>

<mosaic_0001>
module attributes {stable_mosaic.version = 11 : i64} {
  func.func @kernel(%arg0: memref<8x32xf32, #tpu.memory_space<vmem>>, %arg1: memref<2x32x32xf32, #tpu.memory_space<vmem>>, %arg2: memref<2x1x32xf32, #tpu.memory_space<vmem>>, %arg3: memref<32x8xf32, #tpu.memory_space<vmem>>, %arg4: memref<1x8xf32, #tpu.memory_space<vmem>>, %arg5: memref<8x8xf32, #tpu.memory_space<vmem>>) attributes {dimension_semantics = [], scalar_prefetch = 0 : i64, scratch_operands = 0 : i64, tpu.core_type = #tpu.core_type<tc>} {
    %c0 = arith.constant 0 : index
    %c0_0 = arith.constant 0 : index
    %0 = vector.load %arg0[%c0, %c0_0] : memref<8x32xf32, #tpu.memory_space<vmem>>, vector<8x32xf32>
    %c0_1 = arith.constant 0 : index
    %c0_2 = arith.constant 0 : index
    %c0_3 = arith.constant 0 : index
    %1 = vector.load %arg1[%c0_1, %c0_2, %c0_3] : memref<2x32x32xf32, #tpu.memory_space<vmem>>, vector<1x32x32xf32>
    %2 = vector.shape_cast %1 : vector<1x32x32xf32> to vector<32x32xf32>
    %c0_4 = arith.constant 0 : index
    %c0_5 = arith.constant 0 : index
    %c0_6 = arith.constant 0 : index
    %3 = vector.load %arg2[%c0_4, %c0_5, %c0_6] : memref<2x1x32xf32, #tpu.memory_space<vmem>>, vector<1x1x32xf32>
    %4 = vector.shape_cast %3 : vector<1x1x32xf32> to vector<1x32xf32>
    %cst = arith.constant dense<0.000000e+00> : vector<8x32xf32>
    %5 = tpu.matmul %0, %2, %cst {dimension_numbers = #tpu.dot_dimension_numbers<[1], [0], [0], [1], [0, 0, 1, 1], [], []>} : vector<8x32xf32>, vector<32x32xf32>, vector<8x32xf32> -> vector<8x32xf32>
    %6 = vector.broadcast %4 : vector<1x32xf32> to vector<8x32xf32>
    %7 = arith.addf %5, %6 : vector<8x32xf32>
    %cst_7 = arith.constant 0.000000e+00 : f32
    %8 = vector.broadcast %cst_7 : f32 to vector<8x32xf32>
    %9 = arith.maximumf %7, %8 : vector<8x32xf32>
    %c1 = arith.constant 1 : index
    %c0_8 = arith.constant 0 : index
    %c0_9 = arith.constant 0 : index
    %10 = vector.load %arg1[%c1, %c0_8, %c0_9] : memref<2x32x32xf32, #tpu.memory_space<vmem>>, vector<1x32x32xf32>
    %11 = vector.shape_cast %10 : vector<1x32x32xf32> to vector<32x32xf32>
    %c1_10 = arith.constant 1 : index
    %c0_11 = arith.constant 0 : index
    %c0_12 = arith.constant 0 : index
    %12 = vector.load %arg2[%c1_10, %c0_11, %c0_12] : memref<2x1x32xf32, #tpu.memory_space<vmem>>, vector<1x1x32xf32>
    %13 = vector.shape_cast %12 : vector<1x1x32xf32> to vector<1x32xf32>
    %cst_13 = arith.constant dense<0.000000e+00> : vector<8x32xf32>
    %14 = tpu.matmul %9, %11, %cst_13 {dimension_numbers = #tpu.dot_dimension_numbers<[1], [0], [0], [1], [0, 0, 1, 1], [], []>} : vector<8x32xf32>, vector<32x32xf32>, vector<8x32xf32> -> vector<8x32xf32>
    %15 = vector.broadcast %13 : vector<1x32xf32> to vector<8x32xf32>
    %16 = arith.addf %14, %15 : vector<8x32xf32>
    %cst_14 = arith.constant 0.000000e+00 : f32
    %17 = vector.broadcast %cst_14 : f32 to vector<8x32xf32>
    %18 = arith.maximumf %16, %17 : vector<8x32xf32>
    %c0_15 = arith.constant 0 : index
    %c0_16 = arith.constant 0 : index
    %19 = vector.load %arg3[%c0_15, %c0_16] : memref<32x8xf32, #tpu.memory_space<vmem>>, vector<32x8xf32>
    %cst_17 = arith.constant dense<0.000000e+00> : vector<8x8xf32>
    %20 = tpu.matmul %18, %19, %cst_17 {dimension_numbers = #tpu.dot_dimension_numbers<[1], [0], [0], [1], [0, 0, 1, 1], [], []>} : vector<8x32xf32>, vector<32x8xf32>, vector<8x8xf32> -> vector<8x8xf32>
    %c0_18 = arith.constant 0 : index
    %c0_19 = arith.constant 0 : index
    %21 = vector.load %arg4[%c0_18, %c0_19] : memref<1x8xf32, #tpu.memory_space<vmem>>, vector<1x8xf32>
    %22 = vector.broadcast %21 : vector<1x8xf32> to vector<8x8xf32>
    %23 = arith.addf %20, %22 : vector<8x8xf32>
    %c0_20 = arith.constant 0 : index
    %c0_21 = arith.constant 0 : index
    %24 = vector.load %arg5[%c0_20, %c0_21] : memref<8x8xf32, #tpu.memory_space<vmem>>, vector<8x8xf32>
    tpu.vector_store %arg5[%c0_20, %c0_21], %23 {strides = array<i32>} : memref<8x8xf32, #tpu.memory_space<vmem>>, vector<8x8xf32>,
    return
  }
}

</mosaic_0001>

<bundles_post_ra>
// kernel: tpu_custom_call.1
= control target key start
LH: loop header
LB: loop body
LE: loop exit
PB: predicated region body
PF: predicated region fallthrough
CT: control target
= control target key end

     0   :  { %10 = vsyncpa [#allocation3], 0  ;;  %s529_s0 = inlined_call_operand.vmem [shape: f32[8,32], index: 0, kind: input, shape index: {}]   ;;  %s530_s1 = inlined_call_operand.hbm [shape: f32[2,32,32], index: 1, kind: input, shape index: {}]   ;;  %s531_s2 = inlined_call_operand.vmem [shape: f32[2,1,32], index: 2, kind: input, shape index: {}]   ;;  %s532_s3 = inlined_call_operand.vmem [shape: f32[32,8], index: 3, kind: input, shape index: {}]   ;;  %s533_s4 = inlined_call_operand.vmem [shape: f32[1,8], index: 4, kind: input, shape index: {}]   ;;  %s534_s5 = inlined_call_operand.hbm [shape: f32[8,8], index: 5, kind: output, shape index: {}]  }
   0x1   :  { %11 = vsyncpa [#allocation4], 0  ;;  %s438_s18 = smov [#allocation2]   ;;  %s390_s22 = scalar_lea.hbm %s530_s1, 1024 }
   0x2   :  { %s19_s19 = sshll.u32 %s438_s18, 4  ;;  %p391_p0 = scmp.ne.s32.totalorder %s530_s1, %s390_s22  ;;  %s20_s19 = int_to_ptr.vmem [resolvable:$true] %s19_s19 }
   0x3   :  { %p394_p1 = scmp.lt.u32.totalorder %s390_s22, %s530_s1 }
   0x5   :  { %p396_p2 = pnand %p394_p1, %p391_p0 }
   0x7   :  { %399 = shalt.err (!%p396_p2)
}
   0x8   :  { %s400_s27 = scalar_lea.vmem %s20_s19, 1024  ;;  %p405_p4 = scmp.lt.s32.totalorder %s20_s19, %s20_s19 }
   0x9   :  { %p401_p3 = scmp.ne.s32.totalorder %s20_s19, %s400_s27  ;;  %p406_p5 = scmp.lt.s32.totalorder %s400_s27, %s400_s27 }
   0xb   :  { %p407_p6 = por %p406_p5, %p405_p4 }
   0xd   :  { %p408_p7 = pnand %p407_p6, %p401_p3 }
   0xf   :  { %411 = shalt.err (!%p408_p7)
}
  0x10   :  { %s439_s28 = smov 128   ;;  %s440_s29 = smov 8  }
  0x11   :  { %25 = dma.hbm_to_vmem [thread:$0]  %s530_s1, 1024, %s20_s19, [#allocation3], %s439_s28, %s439_s28, %s440_s29  }
  0x12   :  { %434 = dma.done.wait [#allocation3], 1024  }
  0x13   :  { %435 = vsyncadd [#allocation3], 4294966272  ;;  %v441_v0 = vmov 0.0|0.0   ;;  %vm442_vm0 = vmmov 0   ;;  %v443_v1 = vmov 0.0   ;;  %v36_v2 = vld [vmem:[#allocation2] sm:$0xff] }
  0x14   :  { %365 = vmatprep.subr.bf16.mxu0 %v441_v0  ;;  %340 = vmatprep.mubr.msk.f32.mxu0 %vm442_vm0, %v443_v1  ;;  %v37_v3 = vld [vmem:[#allocation2 + $0x8] sm:$0xff]  ;;  %v38_v4 = vld [vmem:[#allocation2 + $0x10] sm:$0xff]  ;;  %v39_v6 = vld [vmem:[#allocation2 + $0x18] sm:$0xff]  ;;  %vm47_vm1 = vcmask 261120   ;;  %s444_s21 = smov [#allocation5]   ;;  %vm293_vm2 = vcmask 64512  }
  0x15   :  { %371 = vmatprep.subr.bf16.mxu1 %v441_v0  ;;  %351 = vmatprep.mubr.msk.f32.mxu1 %vm442_vm0, %v443_v1  ;;  %v366_v5 = vpack.c.bf16 %v37_v3, %v36_v2  ;;  %v123_v7 = vld [vmem:[#allocation2 + $0x20] sm:$0xff]  ;;  %v124_v8 = vld [vmem:[#allocation2 + $0x28] sm:$0xff]  ;;  %v369_v9 = vpack.c.bf16 %v39_v6, %v38_v4  ;;  %v125_v12 = vld [vmem:[#allocation2 + $0x30] sm:$0xff]  ;;  %s301_s22 = sshll.u32 %s444_s21, 4  ;;  %s302_s22 = int_to_ptr.vmem [resolvable:$true] %s301_s22 }
  0x16   :  { %v372_v10 = vpack.c.bf16 %v124_v8, %v123_v7  ;;  %v35_v11 = vld [vmem:[%s529_s0] sm:$0xff]  ;;  %v126_v13 = vld [vmem:[#allocation2 + $0x38] sm:$0xff]  ;;  %v210_v16 = vld [vmem:[%s532_s3 + $0x8] sm:$0xff]  ;;  %p417_p9 = scmp.lt.s32.totalorder %s302_s22, %s302_s22 }
  0x17   :  { %367 = vmatpush3.bf16.msra.mxu0 %v366_v5  ;;  %v375_v14 = vpack.c.bf16 %v126_v13, %v125_v12  ;;  %v209_v15 = vld [vmem:[%s532_s3] sm:$0xff]  ;;  %v211_v23 = vld [vmem:[%s532_s3 + $0x10] sm:$0xff]  ;;  %v212_v24 = vld [vmem:[%s532_s3 + $0x18] sm:$0xff]  ;;  %s412_s3 = scalar_lea.vmem %s302_s22, 128 }
  0x18   :  { %368 = vmatprep.subr.bf16.mxu0 %v441_v0  ;;  %373 = vmatpush3.bf16.msra.mxu1 %v372_v10  ;;  %v378_v17 = vpack.c.bf16 %v210_v16, %v209_v15  ;;  %v310_v18 = vld [vmem:[%s531_s2] ss:$0 sm:$0xff]  ;;  %v381_v25 = vpack.c.bf16 %v212_v24, %v211_v23  ;;  %v313_v26 = vld [vmem:[%s531_s2 + $0x1] ss:$0 sm:$0xff]  ;;  %p413_p8 = scmp.ne.s32.totalorder %s302_s22, %s412_s3  ;;  %p418_p10 = scmp.lt.s32.totalorder %s412_s3, %s412_s3 }
  0x19   :  { %374 = vmatprep.subr.bf16.mxu1 %v441_v0  ;;  %v315_v31 = vld [vmem:[%s533_s4] ss:$0 sm:$0xff] }
  0x1a   :  { %p419_p11 = por %p418_p10, %p417_p9 }
  0x1b   :  { %370 = vmatpush3.bf16.msra.mxu0 %v369_v9 }
  0x1c   :  { %377 = vmatprep.subr.bf16.mxu0 %v441_v0  ;;  %376 = vmatpush3.bf16.msra.mxu1 %v375_v14  ;;  %p420_p12 = pnand %p419_p11, %p413_p8 }
  0x1e   :  { %341 = vmatmul.mubr.msk.f32.vlgmr.msra.gmra.mrb[0].mxu0 %vm47_vm1, %v35_v11 }
  0x1f   :  { %362 = vmatprep.mubr.msk.f32.mxu0 %vm442_vm0, %v443_v1  ;;  %379 = vmatpush3.bf16.msra.mxu0 %v378_v17 }
  0x20   :  { %380 = vmatprep.subr.bf16.mxu0 %v441_v0 }
  0x23   :  { %382 = vmatpush3.bf16.msra.mxu0 %v381_v25 }
  0xf1   :  { %v117_v19 = vpop.f32.mrb[0].mxu0 }
  0xf2   :  { %v118_v20 = vadd.f32 %v310_v18, %v117_v19  ;;  %v342_v21 = vpop.f32.mrb[1].mxu0 }
  0xf4   :  { %v121_v22 = vmax.f32 %v118_v20, 0.0 }
  0xf6   :  { %352 = vmatmul.mubr.msk.f32.vlgmr.msra.gmra.mrb[0].mxu1 %vm47_vm1, %v121_v22 }
 0x1c9   :  { %v204_v27 = vpop.f32.mrb[0].mxu1 }
 0x1ca   :  { %v205_v28 = vadd.f32 %v313_v26, %v204_v27  ;;  %v353_v29 = vpop.f32.mrb[1].mxu1 }
 0x1cc   :  { %v208_v30 = vmax.f32 %v205_v28, 0.0 }
 0x1ce   :  { %363 = vmatmul.mubr.msk.f32.vlgmr.msra.gmra.mrb[2].mxu0 %vm47_vm1, %v208_v30 }
 0x2a1   :  { %v289_v32 = vpop.f32.mrb[2].mxu0 }
 0x2a2   :  { %v290_v33 = vadd.f32 %v315_v31, %v289_v32  ;;  %v364_v34 = vpop.f32.mrb[3].mxu0 }
 0x2a4   :  { %294 = vst.msk [vmem:[#allocation5] sm:$0xff] %vm293_vm2, %v290_v33 }
 0x2a5   :  { %423 = shalt.err (!%p420_p12)
}
 0x2a6   :  { %s424_s24 = scalar_lea.hbm %s534_s5, 128 }
 0x2a7   :  { %p425_p13 = scmp.ne.s32.totalorder %s534_s5, %s424_s24  ;;  %p428_p0 = scmp.lt.u32.totalorder %s424_s24, %s534_s5 }
 0x2a9   :  { %p430_p1 = pnand %p428_p0, %p425_p13 }
 0x2ab   :  { %433 = shalt.err (!%p430_p1)
}
 0x2ac   :  { %304 = dma.vmem_to_hbm [thread:$0]  %s302_s22, 128, %s534_s5, [#allocation4]  }
 0x2ad   :  { %436 = dma.done.wait [#allocation4], 128  }
 0x2ae   :  { %437 = vsyncadd [#allocation4], 4294967168 }
 0x2af   :  { %308 = vsyncpa [#allocation3], 1 }
 0x2b0   :  { %309 = vsyncpa [#allocation4], 1 }

</bundles_post_ra>
